<compile_context>
chip_gen: v5e
topology: v5e:2x2
jax: 0.10.0
libtpu: 0.0.40
codegen_flags: <defaults>
</compile_context>

<pallas_src>
import functools

import jax
import jax.numpy as jnp
from jax.experimental import pallas as pl
from jax.experimental.pallas import tpu as pltpu

BLOCK_SIZE = 8    # max sequence length (T <= block_size)
N_EMBD = 32       # C
HEAD_SIZE = 16    # H


def _head_kernel(x_ref, w_ref, o_ref, *, T, H):
    # x_ref: (tile_b*T, C)  f32  -- flattened rows of one batch tile
    # w_ref: (C, 3*G)       bf16 -- fused [K | Q*C**-0.5 | V]; each group starts
    #                               at a 128-lane-aligned column offset i*G
    # o_ref: (tile_b, T*H)  f32  -- lane-dense output slab (T*H = 128 here)
    rows, _ = x_ref.shape
    tile_b = rows // T
    G = w_ref.shape[1] // 3

    # f32 -> bf16 cast on the VPU inside the kernel (no extra HBM pass over x).
    x = x_ref[...].astype(jnp.bfloat16)

    # Fused QKV projection: one flat MXU matmul over all tile_b*T rows.
    qkv = jnp.dot(x, w_ref[...], preferred_element_type=jnp.float32)   # (rows, 3G)

    # 128-lane-aligned column groups -> plain narrow views (no lane rotate);
    # the reshape only splits the row (sublane-major) dim at a multiple of 8,
    # i.e. the same physical layout.
    k = qkv[:, 0 * G:0 * G + H].reshape(tile_b, T, H)
    q = qkv[:, 1 * G:1 * G + H].reshape(tile_b, T, H)   # C**-0.5 already in W_q
    v = qkv[:, 2 * G:2 * G + H].reshape(tile_b, T, H)

    # ---- attention scores (bf16 MXU inputs, f32 accumulation) ----
    wei = jnp.einsum('bth,bsh->bts',
                     q.astype(jnp.bfloat16), k.astype(jnp.bfloat16),
                     preferred_element_type=jnp.float32)               # (tile_b, T, T)

    # `tril` is all ones in the original module -> masked_fill is a no-op.
    # ---- numerically stable softmax in f32; denominator on the EUP ----
    wei = wei - jnp.max(wei, axis=-1, keepdims=True)
    e = jnp.exp(wei)
    p = e * pl.reciprocal(jnp.sum(e, axis=-1, keepdims=True), approx=True)

    # ---- weighted sum of values ----
    out = jnp.einsum('bts,bsh->bth',
                     p.astype(jnp.bfloat16), v.astype(jnp.bfloat16),
                     preferred_element_type=jnp.float32)               # (tile_b, T, H)
    out = out.astype(o_ref.dtype)

    # Lane-dense store: pack every sequence's (T, H) result into one 128-lane
    # row so the output HBM DMA is dense/unmasked.  T <= 8, so the static per-t
    # VMEM stores are cheap.
    for t in range(T):
        o_ref[:, t * H:(t + 1) * H] = out[:, t, :]


def _tensorcores_per_chip():
    # v7x shards the "parallel" grid axis across 2 TensorCores; v5e/v6e are
    # single-TC, so forcing extra grid steps there only adds pipeline overhead.
    try:
        kind = jax.devices()[0].device_kind.lower()
    except Exception:
        return 1
    return 2 if ("v7" in kind or "7x" in kind) else 1


def _choose_tile_b(B, max_tile_b, min_steps):
    # Valid batch tiles divide B exactly (no jnp.pad pass over x) and satisfy
    # the (8, 128) block constraint on the output's second-to-last dim
    # (multiple of 8, or the full batch).
    valid = [t for t in range(1, B + 1)
             if B % t == 0 and (t % 8 == 0 or t == B)]

    def pref(t):
        n_steps = B // t
        return (t <= max_tile_b,             # bounded per-step unroll / VMEM
                n_steps % min_steps == 0,    # keep every TensorCore busy (v7x)
                t)                           # then the fewest grid steps
    return max(valid, key=pref)


def head_forward(x, w_key, w_query, w_value, *, max_tile_b=32):
    """x: (B, T, C) f32.  w_*: (C, head_size) f32 (pre-transposed vs nn.Linear)."""
    B, T, C = x.shape
    H = w_key.shape[1]
    TH = T * H
    out_dtype = x.dtype

    # Fused QKV weight with 128-lane-aligned column groups; the module's
    # C**-0.5 scale (C = n_embd, NOT head_size) is folded into W_query.
    G = ((H + 127) // 128) * 128
    w_fused = jnp.zeros((C, 3 * G), dtype=jnp.float32)
    w_fused = w_fused.at[:, 0 * G:0 * G + H].set(w_key)
    w_fused = w_fused.at[:, 1 * G:1 * G + H].set(w_query * (C ** -0.5))
    w_fused = w_fused.at[:, 2 * G:2 * G + H].set(w_value)
    w_fused = w_fused.astype(jnp.bfloat16)

    # Free wrapper-side flatten (contiguous reshape); x stays f32 in HBM.
    x2 = x.reshape(B * T, C)

    min_steps = _tensorcores_per_chip()
    tile_b = _choose_tile_b(B, max_tile_b, min_steps)
    b_pad = B
    if tile_b > 8 * max_tile_b:
        # Pathological batch (e.g. a huge prime): fall back to a padded last tile.
        tile_b = max(8, (max_tile_b // 8) * 8)
        n_steps = -(-B // tile_b)
        b_pad = n_steps * tile_b
        x2 = jnp.pad(x2, ((0, (b_pad - B) * T), (0, 0)))
    n_steps = b_pad // tile_b

    kernel = functools.partial(_head_kernel, T=T, H=H)
    out2 = pl.pallas_call(
        kernel,
        out_shape=jax.ShapeDtypeStruct((b_pad, TH), out_dtype),
        grid_spec=pl.GridSpec(
            grid=(n_steps,),
            in_specs=[
                pl.BlockSpec((tile_b * T, C), lambda i: (i, 0)),
                # Constant index_map -> fused weight stays VMEM-resident.
                pl.BlockSpec((C, 3 * G), lambda i: (0, 0)),
            ],
            out_specs=pl.BlockSpec((tile_b, TH), lambda i: (i, 0)),
        ),
        compiler_params=pltpu.CompilerParams(
            dimension_semantics=("parallel",),
        ),
    )(x2, w_fused)

    return out2[:B].reshape(B, T, H)


def _reference(x, w_key, w_query, w_value):
    # Pure-JAX f32 reference mirroring the PyTorch forward.
    B, T, C = x.shape
    k = x @ w_key
    q = x @ w_query
    v = x @ w_value
    wei = (q @ jnp.swapaxes(k, -2, -1)) * (C ** -0.5)
    wei = jax.nn.softmax(wei, axis=-1)      # tril is all ones -> no causal mask
    return wei @ v


if __name__ == "__main__":
    key = jax.random.PRNGKey(0)
    kx, kk, kq, kv = jax.random.split(key, 4)

    B, T, C, H = 2, BLOCK_SIZE, N_EMBD, HEAD_SIZE

    x = jax.random.normal(kx, (B, T, C), dtype=jnp.float32)
    # nn.Linear(C, H, bias=False).weight is (H, C); store transposed (C, H)
    # with PyTorch-like uniform(-1/sqrt(C), 1/sqrt(C)) init, deterministic.
    bound = 1.0 / (C ** 0.5)
    w_key = jax.random.uniform(kk, (C, H), jnp.float32, -bound, bound)
    w_query = jax.random.uniform(kq, (C, H), jnp.float32, -bound, bound)
    w_value = jax.random.uniform(kv, (C, H), jnp.float32, -bound, bound)

    out = jax.block_until_ready(head_forward(x, w_key, w_query, w_value))

    ref = _reference(x, w_key, w_query, w_value)
    assert out.shape == (B, T, H)
    # bf16 MXU inputs + approximate reciprocal -> loosened tolerance vs f32 ref.
    err = float(jnp.max(jnp.abs(out - ref)))
    assert jnp.allclose(out, ref, atol=5e-2, rtol=5e-2), f"max abs err = {err}"

    print("KERNEL_OK")
</pallas_src>

<mosaic_0001>
module attributes {stable_mosaic.version = 11 : i64} {
  func.func @_head_kernel(%arg0: i32, %arg1: memref<16x32xf32, #tpu.memory_space<vmem>>, %arg2: memref<32x384xbf16, #tpu.memory_space<vmem>>, %arg3: memref<2x128xf32, #tpu.memory_space<vmem>>) attributes {dimension_semantics = [#tpu.dimension_semantics<parallel>], iteration_bounds = array<i64: 1>, scalar_prefetch = 0 : i64, scratch_operands = 0 : i64, tpu.core_type = #tpu.core_type<tc>, window_params = [{transform_indices = @transform_0, window_bounds = array<i64: 16, 32>}, {pipeline_mode = #tpu.pipeline_mode<synchronous>, transform_indices = @transform_1, window_bounds = array<i64: 32, 384>}, {transform_indices = @transform_2, window_bounds = array<i64: 2, 128>}]} {
    %c0 = arith.constant 0 : index
    %c0_0 = arith.constant 0 : index
    %0 = vector.load %arg1[%c0, %c0_0] : memref<16x32xf32, #tpu.memory_space<vmem>>, vector<16x32xf32>
    %1 = arith.truncf %0 : vector<16x32xf32> to vector<16x32xbf16>
    %c0_1 = arith.constant 0 : index
    %c0_2 = arith.constant 0 : index
    %2 = vector.load %arg2[%c0_1, %c0_2] : memref<32x384xbf16, #tpu.memory_space<vmem>>, vector<32x384xbf16>
    %cst = arith.constant dense<0.000000e+00> : vector<16x384xf32>
    %3 = tpu.matmul %1, %2, %cst {dimension_numbers = #tpu.dot_dimension_numbers<[1], [0], [0], [1], [0, 0, 1, 1], [], []>} : vector<16x32xbf16>, vector<32x384xbf16>, vector<16x384xf32> -> vector<16x384xf32>
    %4 = vector.extract_strided_slice %3 {offsets = [0, 0], sizes = [16, 16], strides = [1, 1]} : vector<16x384xf32> to vector<16x16xf32>
    %5 = vector.shape_cast %4 : vector<16x16xf32> to vector<2x8x16xf32>
    %6 = vector.extract_strided_slice %3 {offsets = [0, 128], sizes = [16, 16], strides = [1, 1]} : vector<16x384xf32> to vector<16x16xf32>
    %7 = vector.shape_cast %6 : vector<16x16xf32> to vector<2x8x16xf32>
    %8 = vector.extract_strided_slice %3 {offsets = [0, 256], sizes = [16, 16], strides = [1, 1]} : vector<16x384xf32> to vector<16x16xf32>
    %9 = vector.shape_cast %8 : vector<16x16xf32> to vector<2x8x16xf32>
    %10 = arith.truncf %7 : vector<2x8x16xf32> to vector<2x8x16xbf16>
    %11 = arith.truncf %5 : vector<2x8x16xf32> to vector<2x8x16xbf16>
    "tpu.trace_start"() <{level = 10 : i32, message = "bth,bsh->bts"}> : () -> ()
    %cst_3 = arith.constant dense<0.000000e+00> : vector<2x8x8xf32>
    %12 = tpu.matmul %10, %11, %cst_3 {dimension_numbers = #tpu.dot_dimension_numbers<[2], [2], [1], [1], [0, 0, 0, 1, 1, 1], [0], [0]>} : vector<2x8x16xbf16>, vector<2x8x16xbf16>, vector<2x8x8xf32> -> vector<2x8x8xf32>
    "tpu.trace_stop"() : () -> ()
    %cst_4 = arith.constant dense<0xFF800000> : vector<2x8xf32>
    %13 = vector.multi_reduction <maximumf>, %12, %cst_4 [2] : vector<2x8x8xf32> to vector<2x8xf32>
    %14 = vector.shape_cast %13 : vector<2x8xf32> to vector<2x8x1xf32>
    %15 = vector.broadcast %14 : vector<2x8x1xf32> to vector<2x8x8xf32>
    %16 = arith.subf %12, %15 : vector<2x8x8xf32>
    %17 = math.exp %16 : vector<2x8x8xf32>
    %cst_5 = arith.constant dense<0.000000e+00> : vector<2x8xf32>
    %18 = vector.multi_reduction <add>, %17, %cst_5 [2] : vector<2x8x8xf32> to vector<2x8xf32>
    %19 = vector.shape_cast %18 : vector<2x8xf32> to vector<2x8x1xf32>
    %20 = tpu.reciprocal %19 {approx = true} : vector<2x8x1xf32> -> vector<2x8x1xf32>
    %21 = vector.broadcast %20 : vector<2x8x1xf32> to vector<2x8x8xf32>
    %22 = arith.mulf %17, %21 : vector<2x8x8xf32>
    %23 = arith.truncf %22 : vector<2x8x8xf32> to vector<2x8x8xbf16>
    %24 = arith.truncf %9 : vector<2x8x16xf32> to vector<2x8x16xbf16>
    "tpu.trace_start"() <{level = 10 : i32, message = "bts,bsh->bth"}> : () -> ()
    %cst_6 = arith.constant dense<0.000000e+00> : vector<2x8x16xf32>
    %25 = tpu.matmul %23, %24, %cst_6 {dimension_numbers = #tpu.dot_dimension_numbers<[2], [1], [1], [2], [0, 0, 0, 1, 1, 2], [0], [0]>} : vector<2x8x8xbf16>, vector<2x8x16xbf16>, vector<2x8x16xf32> -> vector<2x8x16xf32>
    "tpu.trace_stop"() : () -> ()
    %26 = vector.extract_strided_slice %25 {offsets = [0, 0, 0], sizes = [2, 1, 16], strides = [1, 1, 1]} : vector<2x8x16xf32> to vector<2x1x16xf32>
    %27 = vector.shape_cast %26 : vector<2x1x16xf32> to vector<2x16xf32>
    %c0_7 = arith.constant 0 : index
    %c0_8 = arith.constant 0 : index
    %28 = vector.load %arg3[%c0_7, %c0_8] : memref<2x128xf32, #tpu.memory_space<vmem>>, vector<2x16xf32>
    tpu.vector_store %arg3[%c0_7, %c0_8], %27 {strides = array<i32>} : memref<2x128xf32, #tpu.memory_space<vmem>>, vector<2x16xf32>,
    %29 = vector.extract_strided_slice %25 {offsets = [0, 1, 0], sizes = [2, 1, 16], strides = [1, 1, 1]} : vector<2x8x16xf32> to vector<2x1x16xf32>
    %30 = vector.shape_cast %29 : vector<2x1x16xf32> to vector<2x16xf32>
    %c0_9 = arith.constant 0 : index
    %c16 = arith.constant 16 : index
    %31 = vector.load %arg3[%c0_9, %c16] : memref<2x128xf32, #tpu.memory_space<vmem>>, vector<2x16xf32>
    tpu.vector_store %arg3[%c0_9, %c16], %30 {strides = array<i32>} : memref<2x128xf32, #tpu.memory_space<vmem>>, vector<2x16xf32>,
    %32 = vector.extract_strided_slice %25 {offsets = [0, 2, 0], sizes = [2, 1, 16], strides = [1, 1, 1]} : vector<2x8x16xf32> to vector<2x1x16xf32>
    %33 = vector.shape_cast %32 : vector<2x1x16xf32> to vector<2x16xf32>
    %c0_10 = arith.constant 0 : index
    %c32 = arith.constant 32 : index
    %34 = vector.load %arg3[%c0_10, %c32] : memref<2x128xf32, #tpu.memory_space<vmem>>, vector<2x16xf32>
    tpu.vector_store %arg3[%c0_10, %c32], %33 {strides = array<i32>} : memref<2x128xf32, #tpu.memory_space<vmem>>, vector<2x16xf32>,
    %35 = vector.extract_strided_slice %25 {offsets = [0, 3, 0], sizes = [2, 1, 16], strides = [1, 1, 1]} : vector<2x8x16xf32> to vector<2x1x16xf32>
    %36 = vector.shape_cast %35 : vector<2x1x16xf32> to vector<2x16xf32>
    %c0_11 = arith.constant 0 : index
    %c48 = arith.constant 48 : index
    %37 = vector.load %arg3[%c0_11, %c48] : memref<2x128xf32, #tpu.memory_space<vmem>>, vector<2x16xf32>
    tpu.vector_store %arg3[%c0_11, %c48], %36 {strides = array<i32>} : memref<2x128xf32, #tpu.memory_space<vmem>>, vector<2x16xf32>,
    %38 = vector.extract_strided_slice %25 {offsets = [0, 4, 0], sizes = [2, 1, 16], strides = [1, 1, 1]} : vector<2x8x16xf32> to vector<2x1x16xf32>
    %39 = vector.shape_cast %38 : vector<2x1x16xf32> to vector<2x16xf32>
    %c0_12 = arith.constant 0 : index
    %c64 = arith.constant 64 : index
    %40 = vector.load %arg3[%c0_12, %c64] : memref<2x128xf32, #tpu.memory_space<vmem>>, vector<2x16xf32>
    tpu.vector_store %arg3[%c0_12, %c64], %39 {strides = array<i32>} : memref<2x128xf32, #tpu.memory_space<vmem>>, vector<2x16xf32>,
    %41 = vector.extract_strided_slice %25 {offsets = [0, 5, 0], sizes = [2, 1, 16], strides = [1, 1, 1]} : vector<2x8x16xf32> to vector<2x1x16xf32>
    %42 = vector.shape_cast %41 : vector<2x1x16xf32> to vector<2x16xf32>
    %c0_13 = arith.constant 0 : index
    %c80 = arith.constant 80 : index
    %43 = vector.load %arg3[%c0_13, %c80] : memref<2x128xf32, #tpu.memory_space<vmem>>, vector<2x16xf32>
    tpu.vector_store %arg3[%c0_13, %c80], %42 {strides = array<i32>} : memref<2x128xf32, #tpu.memory_space<vmem>>, vector<2x16xf32>,
    %44 = vector.extract_strided_slice %25 {offsets = [0, 6, 0], sizes = [2, 1, 16], strides = [1, 1, 1]} : vector<2x8x16xf32> to vector<2x1x16xf32>
    %45 = vector.shape_cast %44 : vector<2x1x16xf32> to vector<2x16xf32>
    %c0_14 = arith.constant 0 : index
    %c96 = arith.constant 96 : index
    %46 = vector.load %arg3[%c0_14, %c96] : memref<2x128xf32, #tpu.memory_space<vmem>>, vector<2x16xf32>
    tpu.vector_store %arg3[%c0_14, %c96], %45 {strides = array<i32>} : memref<2x128xf32, #tpu.memory_space<vmem>>, vector<2x16xf32>,
    %47 = vector.extract_strided_slice %25 {offsets = [0, 7, 0], sizes = [2, 1, 16], strides = [1, 1, 1]} : vector<2x8x16xf32> to vector<2x1x16xf32>
    %48 = vector.shape_cast %47 : vector<2x1x16xf32> to vector<2x16xf32>
    %c0_15 = arith.constant 0 : index
    %c112 = arith.constant 112 : index
    %49 = vector.load %arg3[%c0_15, %c112] : memref<2x128xf32, #tpu.memory_space<vmem>>, vector<2x16xf32>
    tpu.vector_store %arg3[%c0_15, %c112], %48 {strides = array<i32>} : memref<2x128xf32, #tpu.memory_space<vmem>>, vector<2x16xf32>,
    return
  }
  func.func @transform_0(%arg0: i32) -> (i32, i32) {
    %c0_i32 = arith.constant 0 : i32
    %c0_i32_0 = arith.constant 0 : i32
    return %arg0, %c0_i32 : i32, i32
  }
  func.func @transform_1(%arg0: i32) -> (i32, i32) {
    %c0_i32 = arith.constant 0 : i32
    %c0_i32_0 = arith.constant 0 : i32
    %c0_i32_1 = arith.constant 0 : i32
    return %c0_i32, %c0_i32_0 : i32, i32
  }
  func.func @transform_2(%arg0: i32) -> (i32, i32) {
    %c0_i32 = arith.constant 0 : i32
    %c0_i32_0 = arith.constant 0 : i32
    return %arg0, %c0_i32 : i32, i32
  }
}

</mosaic_0001>

<bundles_post_ra>
// kernel: tpu_custom_call.1
= control target key start
LH: loop header
LB: loop body
LE: loop exit
PB: predicated region body
PF: predicated region fallthrough
CT: control target
= control target key end

     0   :  { %7 = vsyncpa [#allocation3], 0  ;;  %s505_s0 = inlined_call_operand.hbm [shape: f32[16,32], index: 0, kind: input, shape index: {}]   ;;  %s506_s1 = inlined_call_operand.hbm [shape: bf16[32,384], index: 1, kind: input, shape index: {}]   ;;  %s507_s2 = inlined_call_operand.hbm [shape: f32[2,128], index: 2, kind: output, shape index: {}]  }
   0x1   :  { %8 = vsyncpa [#allocation6], 0 }
   0x2   :  { %9 = vsyncpa [#allocation4], 0  ;;  %s14_s11 = sshll.u32 %s505_s0, 4  ;;  %s458_s12 = smov [#allocation2]   ;;  %s15_s11 = int_to_ptr.hbm [resolvable:$true] %s14_s11 }
   0x3   :  { %s16_s13 = sshll.u32 %s458_s12, 4  ;;  %s27_s16 = sshll.u32 %s506_s1, 4  ;;  %s17_s13 = int_to_ptr.vmem [resolvable:$true] %s16_s13  ;;  %s28_s16 = int_to_ptr.hbm [resolvable:$true] %s27_s16 }
   0x4   :  { %s459_s17 = smov 128   ;;  %s460_s18 = smov 8  }
   0x5   :  { %22 = dma.hbm_to_vmem [thread:$0]  %s15_s11, 256, %s17_s13, [#allocation3], %s459_s17, %s459_s17, %s460_s18  }
   0x6   :  { %s461_s19 = smov [#allocation5]   ;;  %s462_s21 = smov 192  }
   0x7   :  { %s29_s20 = sshll.u32 %s461_s19, 4  ;;  %s463_s22 = smov 12   ;;  %s30_s20 = int_to_ptr.vmem [resolvable:$true] %s29_s20 }
   0x8   :  { %35 = dma.hbm_to_vmem [thread:$0]  %s28_s16, 768, %s30_s20, [#allocation6], %s462_s21, %s462_s21, %s463_s22  }
   0x9   :  { %452 = dma.done.wait [#allocation3], 256  }
   0xa   :  { %453 = vsyncadd [#allocation3], 4294967040 }
   0xb   :  { %454 = dma.done.wait [#allocation6], 768  }
   0xc   :  { %455 = vsyncadd [#allocation6], 4294966528  ;;  %v335_v0 = vld [vmem:[#allocation5 + $0x18] sm:$0xf]  ;;  %v356_v1 = vld [vmem:[#allocation5 + $0x20] sm:$0xf0] }
   0xd   :  { %v323_v2 = vld [vmem:[#allocation5] sm:$0xf]  ;;  %v336_v3 = vor.u32 %v356_v1, %v335_v0  ;;  %v353_v4 = vld [vmem:[#allocation5 + $0x8] sm:$0xf0]  ;;  %v355_v5 = vld [vmem:[#allocation5 + $0x1c] sm:$0xf] }
   0xe   :  { %v337_v6 = vld [vmem:[#allocation5 + $0x24] sm:$0xf0]  ;;  %v352_v7 = vld [vmem:[#allocation5 + $0x4] sm:$0xf]  ;;  %v324_v8 = vor.u32 %v353_v4, %v323_v2  ;;  %v45_v9 = vld [vmem:[#allocation2] sm:$0xff]  ;;  %vm88_vm0 = vcmask 261120  }
   0xf   :  { %98 = vmatpush.bf16.msra.mxu0 %v336_v3  ;;  %v46_v10 = vld [vmem:[#allocation2 + $0x8] sm:$0xff]  ;;  %v340_v11 = vor.u32 %v355_v5, %v337_v6  ;;  %v325_v12 = vld [vmem:[#allocation5 + $0xc] sm:$0xf0]  ;;  %vm138_vm1 = vcmask 130048   ;;  %v343_v25 = vld [vmem:[#allocation5 + $0x20] sm:$0xf] }
  0x10   :  { %v328_v13 = vor.u32 %v352_v7, %v325_v12  ;;  %v47_v14 = vpack.c.bf16 %v46_v10, %v45_v9  ;;  %v357_v26 = vld [vmem:[#allocation5 + $0x28] sm:$0xf0]  ;;  %v331_v27 = vld [vmem:[#allocation5 + $0x8] sm:$0xf]  ;;  %v354_v29 = vld [vmem:[#allocation5 + $0x10] sm:$0xf0] }
  0x11   :  { %112 = vmatpush.bf16.msra.mxu1 %v340_v11  ;;  %v344_v28 = vor.u32 %v357_v26, %v343_v25  ;;  %v332_v30 = vor.u32 %v354_v29, %v331_v27  ;;  %vm177_vm2 = vcmask 64512   ;;  %vm207_vm3 = vcmask 1043456   ;;  %s464_s0 = smov 64   ;;  %s465_s1 = smov 48  }
  0x12   :  { %vm272_vm4 = vcmask 1045509   ;;  %vm265_vm5 = vcmask 1044484   ;;  %vm251_vm6 = vcmask 1042434   ;;  %vm246_vm7 = vcmask 1041409   ;;  %s466_s23 = smov 16   ;;  %s467_s24 = smov 112  }
  0x13   :  { %99 = vmatpush.bf16.msra.mxu0 %v324_v8  ;;  %126 = vmatpush.bf16.msra.mxu2 %v344_v28  ;;  %vm249_vm8 = vcmask 123904   ;;  %vm258_vm9 = vcmask 1043459   ;;  %s468_s25 = smov 32   ;;  %vm279_vm10 = vcmask 1046534   ;;  %s469_s26 = smov 80   ;;  %vm286_vm11 = vcmask 1047559  }
  0x14   :  { %s470_s27 = smov 96   ;;  %vm256_vm12 = vcmask 256129   ;;  %vm263_vm13 = vcmask 388354   ;;  %vm270_vm14 = vcmask 520579   ;;  %vm277_vm15 = vcmask 652804   ;;  %s471_s28 = smov [#allocation7]  }
  0x15   :  { %113 = vmatpush.bf16.msra.mxu1 %v328_v13  ;;  %s308_s29 = sshll.u32 %s471_s28, 4  ;;  %s310_s4 = sshll.u32 %s507_s2, 4  ;;  %s309_s29 = int_to_ptr.vmem [resolvable:$true] %s308_s29  ;;  %s311_s4 = int_to_ptr.hbm [resolvable:$true] %s310_s4 }
  0x16   :  { %345 = vmatmul.msk.bf16.vlgmr.msra.gmra.mxu0 %vm88_vm0, %v47_v14 }
  0x17   :  { %127 = vmatpush.bf16.msra.mxu2 %v332_v30 }
  0x18   :  { %346 = vmatmul.msk.bf16.vlgmr.msra.gmra.mxu1 %vm88_vm0, %v47_v14 }
  0x1a   :  { %347 = vmatmul.msk.bf16.vlgmr.msra.gmra.mxu2 %vm88_vm0, %v47_v14  ;;  %vm284_vm0 = vcmask 785029  }
  0x93   :  { %v101_v15 = vpop.f32.mrf.mxu0 }
  0x94   :  { %v136_v16 = vpack.c.bf16 %v101_v15, %v101_v15 }
  0x95   :  { %v115_v18 = vpop.f32.mrf.mxu1 }
  0x96   :  { %v143_v17 = vsel %vm138_vm1, %v136_v16, 0  ;;  %v134_v19 = vpack.c.bf16 %v115_v18, %v115_v18 }
  0x97   :  { %152 = vmatpush.bf16.xpose.msra.mxu3 %v143_v17 }
  0x9b   :  { %v103_v20 = vpop.f32.mrf.mxu0 }
  0x9c   :  { %v137_v21 = vpack.c.bf16 %v103_v20, %v103_v20 }
  0x9d   :  { %v117_v23 = vpop.f32.mrf.mxu1  ;;  %v129_v39 = vpop.f32.mrf.mxu2 }
  0x9e   :  { %348 = vmatmul.msk.bf16.vlgmr.msra.gmra.mxu3 %vm138_vm1, %v134_v19  ;;  %v162_v22 = vsel %vm138_vm1, %v137_v21, 0  ;;  %v135_v24 = vpack.c.bf16 %v117_v23, %v117_v23  ;;  %v202_v41 = vpack.c.bf16 %v129_v39, %v129_v39 }
  0x9f   :  { %171 = vmatpush.bf16.xpose.msrb.mxu0 %v162_v22 }
  0xa0   :  { %v209_v42 = vsel %vm207_vm3, %v202_v41, 0 }
  0xa1   :  { %218 = vmatpush.bf16.msrb.mxu1 %v209_v42 }
  0xa5   :  { %v131_v45 = vpop.f32.mrf.mxu2 }
  0xa6   :  { %349 = vmatmul.msk.bf16.vlgmr.msrb.gmra.mxu0 %vm138_vm1, %v135_v24  ;;  %v203_v48 = vpack.c.bf16 %v131_v45, %v131_v45  ;;  %vm291_vm1 = vcmask 917254  }
  0xa8   :  { %v228_v50 = vsel %vm207_vm3, %v203_v48, 0  ;;  %vm299_vm3 = vcmask 1048455  }
  0xa9   :  { %237 = vmatpush.bf16.msrb.mxu2 %v228_v50 }
 0x121   :  { %v154_v31 = vpop.f32.mrf.mxu3 }
 0x122   :  { %v178_v36 = vsel %vm177_vm2, %v154_v31, -inf }
 0x123   :  { %v173_v32 = vpop.f32.mrf.mxu0 }
 0x124   :  { %v181_v33 = vsel %vm177_vm2, %v173_v32, -inf }
 0x125   :  { %182 = vmax.xlane.f32.xlu0 %v181_v33 }
 0x129   :  { %v156_v34 = vpop.f32.mrf.mxu3 }
 0x12b   :  { %v175_v35 = vpop.f32.mrf.mxu0 }
 0x12d   :  { %179 = vmax.xlane.f32.xlu0 %v178_v36 }
 0x198   :  { %v183_v37 = vpop.xlane.xlu0 %182 }
 0x199   :  { %v185_v38 = vsub.f32 %v173_v32, %v183_v37 }
 0x19b   :  { %v188_v40 = vmul.f32 1.442695, %v185_v38 }
 0x19d   :  { %372 = vpow2.f32 %v188_v40 }
 0x1a0   :  { %v180_v43 = vpop.xlane.xlu0 %179 }
 0x1a1   :  { %v184_v44 = vsub.f32 %v154_v31, %v180_v43 }
 0x1a3   :  { %v373_v46 = vpop.eup %372  ;;  %v186_v47 = vmul.f32 1.442695, %v184_v44 }
 0x1a4   :  { %v193_v49 = vsel %vm177_vm2, %v373_v46, 0.0 }
 0x1a5   :  { %374 = vpow2.f32 %v186_v47  ;;  %194 = vadd.xlane.f32.xlu1 %v193_v49 }
 0x1ab   :  { %v375_v51 = vpop.eup %374 }
 0x1ac   :  { %v190_v52 = vsel %vm177_vm2, %v375_v51, 0.0 }
 0x1ad   :  { %191 = vadd.xlane.f32.xlu1 %v190_v52 }
 0x218   :  { %v195_v53 = vpop.xlane.xlu1 %194 }
 0x219   :  { %376 = vrcp.f32 %v195_v53 }
 0x21f   :  { %v377_v54 = vpop.eup %376 }
 0x220   :  { %v199_v55 = vmul.f32 %v377_v54, %v373_v46  ;;  %v192_v56 = vpop.xlane.xlu1 %191 }
 0x221   :  { %378 = vrcp.f32 %v192_v56 }
 0x222   :  { %v201_v57 = vpack.c.bf16 %v199_v55, %v199_v55 }
 0x224   :  { %351 = vmatmul.msk.bf16.vlgmr.msrb.gmra.mxu2 %vm177_vm2, %v201_v57 }
 0x227   :  { %v379_v58 = vpop.eup %378 }
 0x228   :  { %v198_v59 = vmul.f32 %v379_v58, %v375_v51 }
 0x22a   :  { %v200_v60 = vpack.c.bf16 %v198_v59, %v198_v59 }
 0x22c   :  { %350 = vmatmul.msk.bf16.vlgmr.msrb.gmra.mxu1 %vm177_vm2, %v200_v60  ;;  %vm301_vm2 = vcmask 1041280  }
 0x2a7   :  { %v239_v61 = vpop.f32.mrf.mxu2 }
 0x2a8   :  { %v245_v62 = vrot.slane %v239_v61, 7 }
 0x2a9   :  { %v220_v63 = vpop.f32.mrf.mxu1 }
 0x2aa   :  { %v273_v0 = vsel %vm272_vm4, %v245_v62, %v220_v63  ;;  %v266_v1 = vsel %vm265_vm5, %v245_v62, %v220_v63  ;;  %v252_v2 = vsel %vm251_vm6, %v245_v62, %v220_v63  ;;  %v247_v3 = vsel %vm246_vm7, %v245_v62, %v220_v63 }
 0x2ab   :  { %274 = vrot.lane.b32.xlu1 %v273_v0, %s464_s0  ;;  %267 = vrot.lane.b32.xlu0 %v266_v1, %s465_s1  ;;  %250 = vst.msk [vmem:[#allocation7] sm:$0x3] %vm249_vm8, %v247_v3  ;;  %v259_v6 = vsel %vm258_vm9, %v245_v62, %v220_v63  ;;  %v280_v7 = vsel %vm279_vm10, %v245_v62, %v220_v63 }
 0x2ac   :  { %253 = vrot.lane.b32.xlu2 %v252_v2, %s466_s23  ;;  %v287_v8 = vsel %vm286_vm11, %v245_v62, %v220_v63 }
 0x2af   :  { %v241_v4 = vpop.f32.mrf.mxu2 }
 0x2b1   :  { %v222_v5 = vpop.f32.mrf.mxu1 }
 0x2b3   :  { %295 = vrot.lane.b32.xlu0 %v245_v62, %s467_s24 }
 0x2b4   :  { %260 = vrot.lane.b32.xlu2 %v259_v6, %s468_s25 }
 0x2bc   :  { %281 = vrot.lane.b32.xlu2 %v280_v7, %s469_s26 }
 0x2c4   :  { %288 = vrot.lane.b32.xlu2 %v287_v8, %s470_s27 }
 0x2cc   :  { %293 = vrot.lane.b32.xlu2 %v220_v63, %s467_s24 }
 0x306   :  { %v254_v9 = vpop.permute.xlu2 %253 }
 0x307   :  { %257 = vst.msk [vmem:[#allocation7 - $0x1] sm:$0x6] %vm256_vm12, %v254_v9 }
 0x30e   :  { %v261_v10 = vpop.permute.xlu2 %260 }
 0x30f   :  { %264 = vst.msk [vmem:[#allocation7 - $0x2] sm:$0xc] %vm263_vm13, %v261_v10 }
 0x316   :  { %v282_v11 = vpop.permute.xlu2 %281 }
 0x31d   :  { %v275_v12 = vpop.permute.xlu1 %274  ;;  %v268_v13 = vpop.permute.xlu0 %267 }
 0x31e   :  { %271 = vst.msk [vmem:[#allocation7 - $0x3] sm:$0x18] %vm270_vm14, %v268_v13  ;;  %v289_v14 = vpop.permute.xlu2 %288 }
 0x31f   :  { %278 = vst.msk [vmem:[#allocation7 - $0x4] sm:$0x30] %vm277_vm15, %v275_v12 }
 0x320   :  { %285 = vst.msk [vmem:[#allocation7 - $0x5] sm:$0x60] %vm284_vm0, %v282_v11 }
 0x321   :  { %292 = vst.msk [vmem:[#allocation7 - $0x6] sm:$0xc0] %vm291_vm1, %v289_v14 }
 0x325   :  { %v296_v15 = vpop.permute.xlu0 %295 }
 0x326   :  { %302 = vst.msk [vmem:[#allocation7 + $0x1] sm:$0x1] %vm301_vm2, %v296_v15  ;;  %v294_v16 = vpop.permute.xlu2 %293 }
 0x327   :  { %300 = vst.msk [vmem:[#allocation7 - $0x7] sm:$0x80] %vm299_vm3, %v294_v16 }
 0x328   :  { %313 = dma.vmem_to_hbm [thread:$0]  %s309_s29, 32, %s311_s4, [#allocation4]  }
 0x329   :  { %456 = dma.done.wait [#allocation4], 32  }
 0x32a   :  { %457 = vsyncadd [#allocation4], 4294967264 }
 0x32b   :  { %318 = vsyncpa [#allocation3], 1 }
 0x32c   :  { %319 = vsyncpa [#allocation6], 1 }
 0x32d   :  { %320 = vsyncpa [#allocation4], 1 }

</bundles_post_ra>
